<compile_context>
chip_gen: v7x
topology: tpu7x:2x2x1
jax: 0.10.0
libtpu: 0.0.40
codegen_flags: <defaults>
</compile_context>

<pallas_src>
import functools

import jax
import jax.numpy as jnp
from jax import lax
from jax.experimental import pallas as pl
from jax.experimental.pallas import tpu as pltpu


def _round_up(v, m):
    return (v + m - 1) // m * m


def _infonce_kernel(x_ref, smp_ref, wcos_ref, wden_ref, wnom_ref,
                    nom_ref, den_ref, *, inv_t):
    """Grid = (batch tiles, sample tiles); both axes parallel (no carried state)."""
    eps = 1e-8

    x = x_ref[...]        # (TB, 1, F)   caller dtype
    smp = smp_ref[...]    # (TB, TS, F)  caller dtype

    # x . sample on the MXU (batched matvec, f32 accumulation).
    dots = jnp.einsum('bqf,bsf->bqs', x, smp,
                      preferred_element_type=jnp.float32)[:, 0, :]     # (TB, TS)

    # Squared norms: square in the input dtype, accumulate in f32.  No stored
    # f32 copy of the sample tile.
    x_sq = jnp.sum((x * x).astype(jnp.float32), axis=-1)               # (TB, 1)
    s_sq = jnp.sum((smp * smp).astype(jnp.float32), axis=-1)           # (TB, TS)

    # cos = dot / max(||x||*||s||, eps)  (torch.cosine_similarity semantics),
    # via rsqrt (EUP slot) + multiply instead of sqrt + divide.
    inv_norm = lax.rsqrt(jnp.maximum(x_sq * s_sq, eps * eps))          # (TB, TS)
    sim = dots * inv_norm * wcos_ref[...]       # weighted cosine similarity

    # wden: 1 for valid columns, 0 for padding; wnom additionally selects the
    # positive columns.  Multiplicative post-exp masks keep padded lanes NaN-free.
    e = jnp.exp(sim * inv_t) * wden_ref[...]
    nom_ref[...] = jnp.sum(e * wnom_ref[...], axis=-1, keepdims=True)[None]
    den_ref[...] = jnp.sum(e, axis=-1, keepdims=True)[None]


def weighted_infonce_loss(x, pos, neg, neg_weight=None, temperature=0.2):
    """JAX/Pallas equivalent of WeightedInfoNCELoss.forward (returns a scalar)."""
    x = jnp.asarray(x)
    pos = jnp.asarray(pos)
    neg = jnp.asarray(neg)

    # Same flattening rules as the PyTorch module.
    if x.ndim > 2:
        x = x.reshape(x.shape[0], -1)
    if pos.ndim > 3:
        pos = pos.reshape(pos.shape[0], pos.shape[1], -1)
    if neg.ndim > 3:
        neg = neg.reshape(neg.shape[0], neg.shape[1], -1)

    B, F = x.shape
    P = pos.shape[1]
    N = neg.shape[1]
    S = P + N

    # Preserve caller dtype for the big tensors (e.g. bf16); fall back to f32
    # for non-float inputs.  All accumulation in the kernel is f32.
    cdt = jnp.promote_types(jnp.promote_types(x.dtype, pos.dtype), neg.dtype)
    if not jnp.issubdtype(cdt, jnp.floating):
        cdt = jnp.float32
    x = x.astype(cdt)
    pos = pos.astype(cdt)
    neg = neg.astype(cdt)

    if neg_weight is None:
        w_neg = jnp.ones((B, N), jnp.float32)
    else:
        w_neg = jnp.asarray(neg_weight, jnp.float32)

    # One fused sample stream + three tiny precomputed f32 rows (no in-kernel
    # iota / compare / select work):
    #   w_cos : cosine multiplier (1 for pos, neg_weight for neg)
    #   w_den : 1 for valid columns, 0 for padding (post-exp mask)
    #   w_nom : 1 for positive columns, 0 otherwise (post-exp mask)
    samples = jnp.concatenate([pos, neg], axis=1)                        # (B, S, F)
    ones_p = jnp.ones((B, P), jnp.float32)
    w_cos = jnp.concatenate([ones_p, w_neg], axis=1)
    w_den = jnp.ones((B, S), jnp.float32)
    w_nom = jnp.concatenate([ones_p, jnp.zeros((B, N), jnp.float32)], axis=1)

    # ---- tile selection --------------------------------------------------
    itemsize = jnp.dtype(cdt).itemsize
    if B <= 8:
        tb, b_pad = B, B
    else:
        tb, b_pad = 8, _round_up(B, 8)

    # ~4 MiB sample tile per buffer (double-buffered => ~8 MiB dominant stream),
    # amortizing the ~0.35 us per-grid-step overhead while the total footprint
    # stays inside scoped VMEM on v5e / v6e / v7x.
    budget = 4 * 1024 * 1024
    row_bytes = tb * F * itemsize
    ts_cap = (budget // max(1, row_bytes)) // 128 * 128
    if ts_cap == 0:
        # TODO(synk): very large flattened F (a single 128-row tile exceeds the
        # budget) wants an extra F-reduction grid axis with f32 dot/norm
        # accumulators; fall back to the minimum legal tile here.
        ts_cap = 128
    if S <= ts_cap:
        ts, s_pad = S, S            # single sample tile, no padding needed
    else:
        ts = ts_cap
        s_pad = _round_up(S, ts)

    if s_pad != S:
        samples = jnp.pad(samples, ((0, 0), (0, s_pad - S), (0, 0)))
        w_cos = jnp.pad(w_cos, ((0, 0), (0, s_pad - S)))
        w_den = jnp.pad(w_den, ((0, 0), (0, s_pad - S)))
        w_nom = jnp.pad(w_nom, ((0, 0), (0, s_pad - S)))
    if b_pad != B:
        x = jnp.pad(x, ((0, b_pad - B), (0, 0)))
        samples = jnp.pad(samples, ((0, b_pad - B), (0, 0), (0, 0)))
        w_cos = jnp.pad(w_cos, ((0, b_pad - B), (0, 0)))
        w_den = jnp.pad(w_den, ((0, b_pad - B), (0, 0)))
        w_nom = jnp.pad(w_nom, ((0, b_pad - B), (0, 0)))

    x3 = x.reshape(b_pad, 1, F)
    n_b = b_pad // tb
    n_s = s_pad // ts

    # Explicit VMEM limit from the actual footprint: double-buffered streams +
    # in-kernel intermediates (in-dtype square of the sample tile plus (TB,TS)
    # f32 temporaries), clamped to stay inside every chip's physical VMEM
    # (v7x: 64 MiB) while raising v5e's 16 MiB scoped default.
    smp_tile = tb * ts * F * itemsize
    x_tile = tb * F * itemsize
    aux_tile = 3 * tb * ts * 4
    out_tile = 2 * tb * 4
    vmem_bytes = 2 * (smp_tile + x_tile + aux_tile + out_tile)
    vmem_bytes += 3 * smp_tile            # squared-sample / convert temporaries
    vmem_bytes += 12 * tb * ts * 4        # dots / sim / exp f32 temporaries
    vmem_bytes += 4 << 20                 # slack
    vmem_limit = int(min(max(vmem_bytes, 32 << 20), 48 << 20))

    kernel = functools.partial(_infonce_kernel, inv_t=1.0 / float(temperature))

    nom_parts, den_parts = pl.pallas_call(
        kernel,
        out_shape=(jax.ShapeDtypeStruct((n_s, b_pad, 1), jnp.float32),
                   jax.ShapeDtypeStruct((n_s, b_pad, 1), jnp.float32)),
        grid_spec=pltpu.PrefetchScalarGridSpec(
            num_scalar_prefetch=0,
            grid=(n_b, n_s),
            in_specs=[
                pl.BlockSpec((tb, 1, F), lambda b, s: (b, 0, 0)),    # x
                pl.BlockSpec((tb, ts, F), lambda b, s: (b, s, 0)),   # samples
                pl.BlockSpec((tb, ts), lambda b, s: (b, s)),         # w_cos
                pl.BlockSpec((tb, ts), lambda b, s: (b, s)),         # w_den
                pl.BlockSpec((tb, ts), lambda b, s: (b, s)),         # w_nom
            ],
            out_specs=[
                pl.BlockSpec((1, tb, 1), lambda b, s: (s, b, 0)),    # nom partials
                pl.BlockSpec((1, tb, 1), lambda b, s: (s, b, 0)),    # den partials
            ],
        ),
        compiler_params=pltpu.CompilerParams(
            dimension_semantics=("parallel", "parallel"),
            vmem_limit_bytes=vmem_limit),
    )(x3, samples, w_cos, w_den, w_nom)

    # Tiny epilogue (O(B * n_s) scalars) kept outside the kernel so both grid
    # axes stay megacore-parallel; padded batch rows are sliced off before the
    # division so they never produce 0/0.
    nom_b = jnp.sum(nom_parts[:, :B, 0], axis=0)
    den_b = jnp.sum(den_parts[:, :B, 0], axis=0)
    return -jnp.log(jnp.sum(nom_b / den_b) / B)


def _reference_loss(x, pos, neg, neg_weight=None, temperature=0.2):
    """Plain-JAX reference mirroring the PyTorch forward exactly (pure f32)."""
    eps = 1e-8
    x = jnp.asarray(x, jnp.float32)
    pos = jnp.asarray(pos, jnp.float32)
    neg = jnp.asarray(neg, jnp.float32)
    if x.ndim > 2:
        x = x.reshape(x.shape[0], -1)
    if pos.ndim > 3:
        pos = pos.reshape(pos.shape[0], pos.shape[1], -1)
    if neg.ndim > 3:
        neg = neg.reshape(neg.shape[0], neg.shape[1], -1)
    xe = x[:, None, :]

    def cos(a, b):
        dot = jnp.sum(a * b, axis=-1)
        na = jnp.sqrt(jnp.sum(a * a, axis=-1))
        nb = jnp.sqrt(jnp.sum(b * b, axis=-1))
        return dot / jnp.maximum(na * nb, eps)

    pos_sim = cos(xe, pos)
    neg_sim = cos(xe, neg)
    if neg_weight is not None:
        neg_sim = neg_sim * jnp.asarray(neg_weight, jnp.float32)
    nom = jnp.sum(jnp.exp(pos_sim / temperature), axis=-1)
    den = jnp.sum(jnp.exp(jnp.concatenate([pos_sim, neg_sim], 1) / temperature),
                  axis=-1)
    return -jnp.log(jnp.mean(nom / den))


if __name__ == "__main__":
    key = jax.random.PRNGKey(0)
    k1, k2, k3, k4 = jax.random.split(key, 4)

    B, P, N, L, FEAT = 2, 4, 6, 8, 32   # flattened feature dim F = L*FEAT = 256
    x = jax.random.normal(k1, (B, L, FEAT), jnp.float32)
    pos = jax.random.normal(k2, (B, P, L, FEAT), jnp.float32)
    neg = jax.random.normal(k3, (B, N, L, FEAT), jnp.float32)
    neg_weight = jax.random.uniform(k4, (B, N), jnp.float32)

    loss = weighted_infonce_loss(x, pos, neg, neg_weight, temperature=0.2)
    loss = jax.block_until_ready(loss)

    ref = _reference_loss(x, pos, neg, neg_weight, temperature=0.2)
    ref = jax.block_until_ready(ref)

    # Tolerance leaves headroom for MXU f32 matmul pass behavior across TPU
    # generations while still catching structural errors (masking, weighting,
    # missing positives in the denominator, etc.).
    assert bool(jnp.isfinite(loss)), loss
    assert jnp.allclose(loss, ref, rtol=2e-3, atol=2e-3), (loss, ref)

    print("KERNEL_OK")
</pallas_src>

<mosaic_0001>
module attributes {stable_mosaic.version = 11 : i64} {
  func.func @_infonce_kernel(%arg0: i32, %arg1: i32, %arg2: memref<2x1x256xf32, #tpu.memory_space<vmem>>, %arg3: memref<2x10x256xf32, #tpu.memory_space<vmem>>, %arg4: memref<2x10xf32, #tpu.memory_space<vmem>>, %arg5: memref<2x10xf32, #tpu.memory_space<vmem>>, %arg6: memref<2x10xf32, #tpu.memory_space<vmem>>, %arg7: memref<1x2x1xf32, #tpu.memory_space<vmem>>, %arg8: memref<1x2x1xf32, #tpu.memory_space<vmem>>) attributes {dimension_semantics = [#tpu.dimension_semantics<parallel>, #tpu.dimension_semantics<parallel>], iteration_bounds = array<i64: 1, 1>, scalar_prefetch = 0 : i64, scratch_operands = 0 : i64, tpu.core_type = #tpu.core_type<tc>, window_params = [{transform_indices = @transform_0, window_bounds = array<i64: 2, 1, 256>}, {transform_indices = @transform_1, window_bounds = array<i64: 2, 10, 256>}, {transform_indices = @transform_2, window_bounds = array<i64: 2, 10>}, {transform_indices = @transform_3, window_bounds = array<i64: 2, 10>}, {transform_indices = @transform_4, window_bounds = array<i64: 2, 10>}, {transform_indices = @transform_5, window_bounds = array<i64: 1, 2, 1>}, {transform_indices = @transform_6, window_bounds = array<i64: 1, 2, 1>}]} {
    %c0 = arith.constant 0 : index
    %c0_0 = arith.constant 0 : index
    %c0_1 = arith.constant 0 : index
    %0 = vector.load %arg2[%c0, %c0_0, %c0_1] : memref<2x1x256xf32, #tpu.memory_space<vmem>>, vector<2x1x256xf32>
    %c0_2 = arith.constant 0 : index
    %c0_3 = arith.constant 0 : index
    %c0_4 = arith.constant 0 : index
    %1 = vector.load %arg3[%c0_2, %c0_3, %c0_4] : memref<2x10x256xf32, #tpu.memory_space<vmem>>, vector<2x10x256xf32>
    "tpu.trace_start"() <{level = 10 : i32, message = "bqf,bsf->bqs"}> : () -> ()
    %cst = arith.constant dense<0.000000e+00> : vector<2x1x10xf32>
    %2 = tpu.matmul %0, %1, %cst {dimension_numbers = #tpu.dot_dimension_numbers<[2], [2], [1], [1], [0, 0, 0, 1, 1, 1], [0], [0]>} : vector<2x1x256xf32>, vector<2x10x256xf32>, vector<2x1x10xf32> -> vector<2x1x10xf32>
    "tpu.trace_stop"() : () -> ()
    %3 = vector.shape_cast %2 : vector<2x1x10xf32> to vector<2x10xf32>
    %4 = arith.mulf %0, %0 : vector<2x1x256xf32>
    %cst_5 = arith.constant dense<0.000000e+00> : vector<2x1xf32>
    %5 = vector.multi_reduction <add>, %4, %cst_5 [2] : vector<2x1x256xf32> to vector<2x1xf32>
    %6 = arith.mulf %1, %1 : vector<2x10x256xf32>
    %cst_6 = arith.constant dense<0.000000e+00> : vector<2x10xf32>
    %7 = vector.multi_reduction <add>, %6, %cst_6 [2] : vector<2x10x256xf32> to vector<2x10xf32>
    %8 = vector.broadcast %5 : vector<2x1xf32> to vector<2x10xf32>
    %9 = arith.mulf %8, %7 : vector<2x10xf32>
    %cst_7 = arith.constant 1.000000e-16 : f32
    %10 = vector.broadcast %cst_7 : f32 to vector<2x10xf32>
    %11 = arith.maximumf %9, %10 : vector<2x10xf32>
    %12 = math.rsqrt %11 : vector<2x10xf32>
    %13 = arith.mulf %3, %12 : vector<2x10xf32>
    %c0_8 = arith.constant 0 : index
    %c0_9 = arith.constant 0 : index
    %14 = vector.load %arg4[%c0_8, %c0_9] : memref<2x10xf32, #tpu.memory_space<vmem>>, vector<2x10xf32>
    %15 = arith.mulf %13, %14 : vector<2x10xf32>
    %cst_10 = arith.constant 5.000000e+00 : f32
    %16 = vector.broadcast %cst_10 : f32 to vector<2x10xf32>
    %17 = arith.mulf %15, %16 : vector<2x10xf32>
    %18 = math.exp %17 : vector<2x10xf32>
    %c0_11 = arith.constant 0 : index
    %c0_12 = arith.constant 0 : index
    %19 = vector.load %arg5[%c0_11, %c0_12] : memref<2x10xf32, #tpu.memory_space<vmem>>, vector<2x10xf32>
    %20 = arith.mulf %18, %19 : vector<2x10xf32>
    %c0_13 = arith.constant 0 : index
    %c0_14 = arith.constant 0 : index
    %21 = vector.load %arg6[%c0_13, %c0_14] : memref<2x10xf32, #tpu.memory_space<vmem>>, vector<2x10xf32>
    %22 = arith.mulf %20, %21 : vector<2x10xf32>
    %cst_15 = arith.constant dense<0.000000e+00> : vector<2xf32>
    %23 = vector.multi_reduction <add>, %22, %cst_15 [1] : vector<2x10xf32> to vector<2xf32>
    %24 = vector.shape_cast %23 : vector<2xf32> to vector<2x1xf32>
    %25 = vector.shape_cast %24 : vector<2x1xf32> to vector<1x2x1xf32>
    %c0_16 = arith.constant 0 : index
    %c0_17 = arith.constant 0 : index
    %c0_18 = arith.constant 0 : index
    %26 = vector.load %arg7[%c0_16, %c0_17, %c0_18] : memref<1x2x1xf32, #tpu.memory_space<vmem>>, vector<1x2x1xf32>
    tpu.vector_store %arg7[%c0_16, %c0_17, %c0_18], %25 {strides = array<i32>} : memref<1x2x1xf32, #tpu.memory_space<vmem>>, vector<1x2x1xf32>,
    %cst_19 = arith.constant dense<0.000000e+00> : vector<2xf32>
    %27 = vector.multi_reduction <add>, %20, %cst_19 [1] : vector<2x10xf32> to vector<2xf32>
    %28 = vector.shape_cast %27 : vector<2xf32> to vector<2x1xf32>
    %29 = vector.shape_cast %28 : vector<2x1xf32> to vector<1x2x1xf32>
    %c0_20 = arith.constant 0 : index
    %c0_21 = arith.constant 0 : index
    %c0_22 = arith.constant 0 : index
    %30 = vector.load %arg8[%c0_20, %c0_21, %c0_22] : memref<1x2x1xf32, #tpu.memory_space<vmem>>, vector<1x2x1xf32>
    tpu.vector_store %arg8[%c0_20, %c0_21, %c0_22], %29 {strides = array<i32>} : memref<1x2x1xf32, #tpu.memory_space<vmem>>, vector<1x2x1xf32>,
    return
  }
  func.func @transform_0(%arg0: i32, %arg1: i32) -> (i32, i32, i32) {
    %c0_i32 = arith.constant 0 : i32
    %c0_i32_0 = arith.constant 0 : i32
    %c0_i32_1 = arith.constant 0 : i32
    return %arg0, %c0_i32, %c0_i32_0 : i32, i32, i32
  }
  func.func @transform_1(%arg0: i32, %arg1: i32) -> (i32, i32, i32) {
    %c0_i32 = arith.constant 0 : i32
    %c0_i32_0 = arith.constant 0 : i32
    return %arg0, %arg1, %c0_i32 : i32, i32, i32
  }
  func.func @transform_2(%arg0: i32, %arg1: i32) -> (i32, i32) {
    %c0_i32 = arith.constant 0 : i32
    return %arg0, %arg1 : i32, i32
  }
  func.func @transform_3(%arg0: i32, %arg1: i32) -> (i32, i32) {
    %c0_i32 = arith.constant 0 : i32
    return %arg0, %arg1 : i32, i32
  }
  func.func @transform_4(%arg0: i32, %arg1: i32) -> (i32, i32) {
    %c0_i32 = arith.constant 0 : i32
    return %arg0, %arg1 : i32, i32
  }
  func.func @transform_5(%arg0: i32, %arg1: i32) -> (i32, i32, i32) {
    %c0_i32 = arith.constant 0 : i32
    %c0_i32_0 = arith.constant 0 : i32
    return %arg1, %arg0, %c0_i32 : i32, i32, i32
  }
  func.func @transform_6(%arg0: i32, %arg1: i32) -> (i32, i32, i32) {
    %c0_i32 = arith.constant 0 : i32
    %c0_i32_0 = arith.constant 0 : i32
    return %arg1, %arg0, %c0_i32 : i32, i32, i32
  }
}

</mosaic_0001>

<bundles_post_ra>
// kernel: tpu_custom_call.1
= control target key start
LH: loop header
LB: loop body
LE: loop exit
PB: predicated region body
PF: predicated region fallthrough
CT: control target
= control target key end

     0   :  { %v33_v0 = vlaneseq  ;;  %vm218_vm0 = vcmask 1040384   ;;  %vm240_vm1 = vcmask 1041408   ;;  %vm289_vm2 = vcmask 130112   ;;  %s476_s1 = inlined_call_operand.vmem [shape: f32[2,10,256], index: 1, kind: input, shape index: {}]   ;;  %s477_s0 = inlined_call_operand.vmem [shape: f32[2,1,256], index: 0, kind: input, shape index: {}]   ;;  %s478_s2 = inlined_call_operand.vmem [shape: f32[2,10], index: 2, kind: input, shape index: {}]   ;;  %s479_s3 = inlined_call_operand.vmem [shape: f32[2,10], index: 3, kind: input, shape index: {}]   ;;  %s480_s4 = inlined_call_operand.vmem [shape: f32[2,10], index: 4, kind: input, shape index: {}]   ;;  %s481_s6 = inlined_call_operand.vmem [shape: f32[1,2,1], index: 6, kind: output, shape index: {1}]   ;;  %s482_s5 = inlined_call_operand.vmem [shape: f32[1,2,1], index: 5, kind: output, shape index: {0}]  }
   0x1   :  { %v25_v1 = vld [vmem:[%s476_s1 + $0x8] sm:$0xff]  ;;  %v27_v2 = vld [vmem:[%s476_s1 + $0x18] sm:$0x3]  ;;  %v24_v6 = vld [vmem:[%s476_s1] sm:$0xff]  ;;  %vm334_vm3 = vcmask 1041409   ;;  %vm337_vm4 = vcmask 74752  }
   0x2   :  { %v29_v3 = vld [vmem:[%s476_s1 + $0x28] sm:$0xff]  ;;  %v360_v4 = vpack.c.bf16 %v27_v2, %v25_v1  ;;  %v31_v5 = vld [vmem:[%s476_s1 + $0x38] sm:$0x3]  ;;  %v26_v7 = vld [vmem:[%s476_s1 + $0x10] sm:$0x3]  ;;  %v434_v8 = vshrl.u32 %v33_v0, 7  ;;  %v232_v24 = vmul.f32 %v27_v2, %v27_v2  ;;  %v230_v45 = vmul.f32 %v25_v1, %v25_v1 }
   0x3   :  { %v364_v9 = vpack.c.bf16 %v31_v5, %v29_v3  ;;  %v236_v10 = vmul.f32 %v31_v5, %v31_v5  ;;  %v362_v11 = vpack.c.bf16 %v26_v7, %v24_v6  ;;  %v28_v12 = vld [vmem:[%s476_s1 + $0x20] sm:$0xff]  ;;  %v30_v13 = vld [vmem:[%s476_s1 + $0x30] sm:$0x3]  ;;  %v234_v23 = vmul.f32 %v29_v3, %v29_v3 }
   0x4   :  { %v22_v14 = vld [vmem:[%s477_s0] sm:$0x3]  ;;  %361 = vmatprep.subr.bf16.mxu0 %v360_v4  ;;  %v366_v15 = vpack.c.bf16 %v30_v13, %v28_v12  ;;  %v235_v16 = vmul.f32 %v30_v13, %v30_v13  ;;  %v39_v17 = vsub.s32 1, %v434_v8  ;;  %v23_v19 = vld [vmem:[%s477_s0 + $0x2] sm:$0x3]  ;;  %v35_v21 = vsub.s32 0, %v434_v8 }
   0x5   :  { %v194_v18 = vmul.f32 %v22_v14, %v22_v14  ;;  %365 = vmatprep.subr.bf16.mxu1 %v364_v9  ;;  %363 = vmatpush1.bf16.xpose.msra.mxu0 %v362_v11  ;;  %v195_v20 = vmul.f32 %v23_v19, %v23_v19  ;;  %v233_v22 = vmul.f32 %v28_v12, %v28_v12  ;;  %v250_v31 = vsel %vm240_vm1, %v236_v10, 0.0 }
   0x6   :  { %v231_v25 = vmul.f32 %v26_v7, %v26_v7  ;;  %367 = vmatpush1.bf16.xpose.msra.mxu1 %v366_v15  ;;  %v40_v26 = vrot.slane %v22_v14, %v39_v17  ;;  %v121_v27 = vrot.slane %v23_v19, %v39_v17  ;;  %v249_v30 = vsel %vm240_vm1, %v235_v16, 0.0 }
   0x7   :  { %v246_v28 = vadd.f32 %v234_v23, %v233_v22  ;;  %v209_v29 = vrot.slane %v195_v20, %v35_v21  ;;  %v36_v32 = vrot.slane %v22_v14, %v35_v21  ;;  %v213_v33 = vrot.slane %v195_v20, %v39_v17  ;;  %v304_v14 = vld [vmem:[%s478_s2] sm:$0x3] }
   0x8   :  { %107 = vmatprep.mubr.f32.mxu0 %v40_v26  ;;  %188 = vmatprep.mubr.f32.mxu1 %v121_v27  ;;  %v201_v34 = vrot.slane %v194_v18, %v35_v21  ;;  %v117_v35 = vrot.slane %v23_v19, %v35_v21  ;;  %v205_v37 = vrot.slane %v194_v18, %v39_v17  ;;  %v241_v43 = vsel %vm240_vm1, %v231_v25, 0.0 }
   0x9   :  { %247 = vadd.xlane.f32.xlu1 %v246_v28  ;;  %v224_v36 = vsel %vm218_vm0, %v209_v29, 0.0  ;;  %v225_v38 = vsel %vm218_vm0, %v213_v33, 0.0  ;;  %v251_v39 = vadd.f32 %v250_v31, %v249_v30  ;;  %v242_v44 = vsel %vm240_vm1, %v232_v24, 0.0  ;;  %v317_v30 = vld [vmem:[%s479_s3] sm:$0x3] }
   0xa   :  { %v219_v40 = vsel %vm218_vm0, %v201_v34, 0.0  ;;  %v226_v41 = vadd.f32 %v225_v38, %v224_v36  ;;  %v220_v42 = vsel %vm218_vm0, %v205_v37, 0.0  ;;  %v229_v47 = vmul.f32 %v24_v6, %v24_v6  ;;  %v324_v31 = vld [vmem:[%s480_s4] sm:$0x3] }
   0xb   :  { %v221_v46 = vadd.f32 %v220_v42, %v219_v40  ;;  %v243_v48 = vadd.f32 %v242_v44, %v241_v43  ;;  %v279_v3 = vand.u32 127, %v33_v0  ;;  %v306_v18 = vrot.slane %v304_v14, 1 }
   0xc   :  { %108 = vmatmul.mubr.f32.vlgmr.msra.gmra.mrb[0].mxu0 %v36_v32  ;;  %227 = vadd.xlane.f32.xlu0 %v226_v41  ;;  %v237_v49 = vadd.f32 %v230_v45, %v229_v47  ;;  %v319_v32 = vrot.slane %v317_v30, 1  ;;  %v326_v34 = vrot.slane %v324_v31, 1  ;;  %vm341_vm5 = vcmask 1024  }
   0xd   :  { %189 = vmatmul.mubr.f32.vlgmr.msra.gmra.mrb[0].mxu1 %v117_v35  ;;  %252 = vadd.xlane.f32.xlu1 %v251_v39  ;;  %v284_v4 = vadd.s32 4294967288, %v279_v3  ;;  %v282_v7 = vsub.s32 %v279_v3, %v434_v8 }
   0xf   :  { %v287_v9 = vsub.s32 %v284_v4, %v434_v8 }
  0x10   :  { %222 = vadd.xlane.f32.xlu0 %v221_v46 }
  0x11   :  { %244 = vadd.xlane.f32.xlu1 %v243_v48 }
  0x14   :  { %238 = vadd.xlane.f32.xlu0 %v237_v49 }
  0x96   :  { %v248_v51 = vpop.xlane.xlu1 %247 }
  0x99   :  { %v228_v50 = vpop.xlane.xlu0 %227 }
  0x9a   :  { %v253_v53 = vpop.xlane.xlu1 %252  ;;  %v261_v57 = vrot.slane %v228_v50, %v35_v21 }
  0x9c   :  { %v264_v60 = vmul.f32 %v261_v57, %v248_v51  ;;  %v265_v61 = vmul.f32 %v261_v57, %v253_v53 }
  0x9d   :  { %v223_v52 = vpop.xlane.xlu0 %222 }
  0x9e   :  { %v257_v54 = vrot.slane %v223_v52, %v35_v21  ;;  %v245_v55 = vpop.xlane.xlu1 %244  ;;  %v268_v1 = vmax.f32 %v264_v60, 1e-16  ;;  %v269_v2 = vmax.f32 %v265_v61, 1e-16 }
  0xa0   :  { %v263_v58 = vmul.f32 %v257_v54, %v245_v55 }
  0xa1   :  { %v239_v56 = vpop.xlane.xlu0 %238 }
  0xa2   :  { %v262_v59 = vmul.f32 %v257_v54, %v239_v56  ;;  %v267_v62 = vmax.f32 %v263_v58, 1e-16 }
  0xa4   :  { %v266_v63 = vmax.f32 %v262_v59, 1e-16  ;;  %368 = vrsqrt.f32 %v267_v62 }
  0xa6   :  { %370 = vrsqrt.f32 %v266_v63 }
  0xa7   :  { %372 = vrsqrt.f32 %v268_v1 }
  0xa8   :  { %374 = vrsqrt.f32 %v269_v2 }
  0xae   :  { %v369_v5 = vpop.eup %368 }
  0xaf   :  { %v288_v13 = vrot.slane %v369_v5, %v287_v9 }
  0xb0   :  { %v371_v6 = vpop.eup %370 }
  0xb1   :  { %v373_v10 = vpop.eup %372  ;;  %v283_v12 = vrot.slane %v371_v6, %v282_v7 }
  0xb2   :  { %v375_v11 = vpop.eup %374  ;;  %v294_v15 = vrot.slane %v373_v10, %v282_v7 }
  0xb3   :  { %v298_v16 = vrot.slane %v375_v11, %v287_v9  ;;  %v290_v17 = vsel %vm289_vm2, %v288_v13, %v283_v12 }
  0xb5   :  { %v299_v21 = vsel %vm289_vm2, %v298_v16, %v294_v15 }
  0xdf   :  { %v109_v0 = vpop.f32.mrb[0].mxu0 }
  0xe0   :  { %v302_v19 = vmul.f32 %v290_v17, %v109_v0  ;;  %v190_v20 = vpop.f32.mrb[0].mxu1  ;;  %v111_v22 = vpop.f32.mrb[1].mxu0 }
  0xe1   :  { %v303_v23 = vmul.f32 %v299_v21, %v190_v20  ;;  %v192_v8 = vpop.f32.mrb[1].mxu1 }
  0xe2   :  { %v309_v24 = vmul.f32 %v304_v14, %v302_v19 }
  0xe3   :  { %v310_v25 = vmul.f32 %v306_v18, %v303_v23 }
  0xe4   :  { %v311_v26 = vmul.f32 5.0, %v309_v24 }
  0xe5   :  { %v312_v27 = vmul.f32 5.0, %v310_v25 }
  0xe6   :  { %v313_v28 = vmul.f32 1.442695, %v311_v26 }
  0xe7   :  { %v315_v29 = vmul.f32 1.442695, %v312_v27 }
  0xe8   :  { %376 = vpow2.f32 %v313_v28 }
  0xe9   :  { %378 = vpow2.f32 %v315_v29 }
  0xf2   :  { %v377_v33 = vpop.eup %376 }
  0xf3   :  { %v379_v35 = vpop.eup %378  ;;  %v322_v36 = vmul.f32 %v377_v33, %v317_v30 }
  0xf4   :  { %v323_v37 = vmul.f32 %v379_v35, %v319_v32 }
  0xf5   :  { %v329_v41 = vmul.f32 %v324_v31, %v322_v36 }
  0xf6   :  { %v345_v38 = vrot.slane %v323_v37, 7  ;;  %v330_v39 = vmul.f32 %v326_v34, %v323_v37 }
  0xf8   :  { %v346_v40 = vsel %vm334_vm3, %v345_v38, %v322_v36  ;;  %v333_v42 = vrot.slane %v330_v39, 7 }
  0xf9   :  { %v348_v43 = vsel %vm337_vm4, %v346_v40, 0.0 }
  0xfa   :  { %349 = vadd.xlane.f32.xlu1 %v348_v43  ;;  %v335_v44 = vsel %vm334_vm3, %v333_v42, %v329_v41 }
  0xfb   :  { %v338_v45 = vsel %vm337_vm4, %v335_v44, 0.0 }
  0xfc   :  { %339 = vadd.xlane.f32.xlu0 %v338_v45 }
 0x187   :  { %v350_v46 = vpop.xlane.xlu1 %349 }
 0x188   :  { %351 = vst.msk [vmem:[%s481_s6] sm:$0x3] %vm341_vm5, %v350_v46 }
 0x189   :  { %v340_v47 = vpop.xlane.xlu0 %339 }
 0x18a   :  { %342 = vst.msk [vmem:[%s482_s5] sm:$0x3] %vm341_vm5, %v340_v47 }

</bundles_post_ra>
